<compile_context>
chip_gen: v6e
topology: v6e:2x2x1
jax: 0.10.0
libtpu: 0.0.40
codegen_flags: <defaults>
</compile_context>

<pallas_src>
import jax
import jax.numpy as jnp
from jax.experimental import pallas as pl
from jax.experimental.pallas import tpu as pltpu


def _pmswc_kernel(x_ref, we_ref, wo_ref, be_ref, bo_ref, s_ref, o_ref):
    """One grid step handles `bt` batch elements, NCL layout.

    x_ref : [bt, C_in, L]   previous_state_column slab
    we_ref: [P*H, C_in]     pair-element-one (even) 1x1 conv weights, reordered
    wo_ref: [P*H, C_in]     pair-element-two (odd)  1x1 conv weights, reordered
    be_ref: [P*H, 1]        even bias
    bo_ref: [P*H, 1]        odd bias
    s_ref : [L, L]          superdiagonal shift matrix (S[l-1, l] = 1)
    o_ref : [bt, P*H, L]    pair-summed outputs (NCL, pair-major channels)
    """
    bt, _, seq_len = x_ref.shape
    we = we_ref[...]
    wo = wo_ref[...]
    s = s_ref[...]

    # Pair-summed bias: even bias everywhere; odd bias only for l >= 1 (the
    # shifted odd element -- bias included -- is zeroed at position 0).
    # One iota + where for the whole kernel (not per pair, not per batch).
    col = jax.lax.broadcasted_iota(jnp.int32, (1, seq_len), 1)
    bias = be_ref[...] + jnp.where(col > 0, bo_ref[...], jnp.float32(0.0))  # [P*H, L]

    for b in range(bt):  # static, short (batch tile is capped in the wrapper)
        x = x_ref[b]  # [C_in, L]
        # x_shift[:, l] = x[:, l-1], zero at l == 0 (folded shift: one MXU op).
        xs = jnp.dot(x, s, preferred_element_type=jnp.float32).astype(x.dtype)
        y = (jnp.dot(we, x, preferred_element_type=jnp.float32)
             + jnp.dot(wo, xs, preferred_element_type=jnp.float32)
             + bias)
        # Single full-block store for this batch element.
        o_ref[b] = y.astype(o_ref.dtype)


def _choose_batch_tile(batch, max_batch_tile=8):
    """Largest divisor of `batch` (<= max_batch_tile) that still leaves >= 2
    grid steps, so v7x's two TensorCores both get work; falls back to 1."""
    if batch <= 1:
        return 1
    best = 1
    for bt in range(1, min(batch, max_batch_tile) + 1):
        if batch % bt == 0 and batch // bt >= 2:
            best = bt
    return best


def parallel_multiple_state_weightings_stacked(x_ncl, weight, bias, *,
                                               hidden_size, num_pairs,
                                               compute_dtype=None):
    """Pair-summed outputs as one stacked NCL array [B, num_pairs*H, L].

    x_ncl : [B, C_in, L]      (PyTorch Conv1d NCL layout)
    weight: [2*P*H, C_in, 1]  (PyTorch Conv1d weight, groups=1)
    bias  : [2*P*H]
    """
    B, C_in, L = x_ncl.shape
    H, P = hidden_size, num_pairs
    C_out = weight.shape[0]
    assert C_out == 2 * P * H
    PH = P * H

    # Reorder conv weights/biases so output channel p*H + h is the summed
    # output of pair p: even half = pair element one, odd half = element two.
    w2 = weight[:, :, 0].reshape(P, 2, H, C_in)
    we = w2[:, 0].reshape(PH, C_in)
    wo = w2[:, 1].reshape(PH, C_in)
    b2 = bias.reshape(P, 2, H)
    be = b2[:, 0].reshape(PH, 1).astype(jnp.float32)
    bo = b2[:, 1].reshape(PH, 1).astype(jnp.float32)

    dt = compute_dtype if compute_dtype is not None else x_ncl.dtype
    x_k = x_ncl.astype(dt)
    we = we.astype(dt)
    wo = wo.astype(dt)
    # Superdiagonal shift matrix: (x @ S)[:, l] == x[:, l-1], zero at l == 0.
    s = jnp.eye(L, k=1, dtype=dt)

    bt = _choose_batch_tile(B)
    n_steps = B // bt

    out_ncl = pl.pallas_call(
        _pmswc_kernel,
        out_shape=jax.ShapeDtypeStruct((B, PH, L), jnp.float32),
        grid=(n_steps,),
        in_specs=[
            pl.BlockSpec((bt, C_in, L), lambda i: (i, 0, 0)),
            pl.BlockSpec((PH, C_in), lambda i: (0, 0)),
            pl.BlockSpec((PH, C_in), lambda i: (0, 0)),
            pl.BlockSpec((PH, 1), lambda i: (0, 0)),
            pl.BlockSpec((PH, 1), lambda i: (0, 0)),
            pl.BlockSpec((L, L), lambda i: (0, 0)),
        ],
        out_specs=pl.BlockSpec((bt, PH, L), lambda i: (i, 0, 0)),
        compiler_params=pltpu.CompilerParams(
            dimension_semantics=("parallel",)),
    )(x_k, we, wo, be, bo, s)
    return out_ncl


def compute_summed_outputs_every_pair(x_ncl, weight, bias, *,
                                      hidden_size, num_pairs,
                                      compute_dtype=None):
    """Module-semantics wrapper: list of `num_pairs` arrays, each [B, H, L]."""
    # TODO(synk): mask (TensorUtils.apply_binary_mask) and use_dropout
    # (F.dropout p=0.2) paths are not implemented; this is the mask=None,
    # use_dropout=False forward path.
    stacked = parallel_multiple_state_weightings_stacked(
        x_ncl, weight, bias, hidden_size=hidden_size, num_pairs=num_pairs,
        compute_dtype=compute_dtype)
    H = hidden_size
    return [stacked[:, p * H:(p + 1) * H, :] for p in range(num_pairs)]


def _reference(x_ncl, weight, bias, *, hidden_size, num_pairs):
    """Plain-JAX reference mirroring the PyTorch code path."""
    y = jnp.einsum("bcl,oc->bol", x_ncl, weight[:, :, 0]) + bias[None, :, None]
    H = hidden_size
    outs = []
    for p in range(num_pairs):
        e1 = y[:, (2 * p) * H:(2 * p + 1) * H, :]
        e2 = y[:, (2 * p + 1) * H:(2 * p + 2) * H, :]
        zeros = jnp.zeros_like(e2[:, :, :1])
        e2_shift = jnp.concatenate([zeros, e2[:, :, :-1]], axis=2)
        outs.append(e1 + e2_shift)
    return outs


def init_params(key, hidden_size, num_pairs):
    """Deterministic stand-in for xavier_uniform_ + grouping correction on
    nn.Conv1d(hidden_size, hidden_size*num_pairs*2, 1)."""
    C_in = hidden_size
    C_out = hidden_size * num_pairs * 2
    kw, kb = jax.random.split(key)
    bound = (6.0 / (C_in + C_out)) ** 0.5
    weight = jax.random.uniform(kw, (C_out, C_in, 1), jnp.float32, -bound, bound)
    # XavierWeightInitializationCorrectionForGrouping: scale by sqrt(#virtual layers)
    weight = weight * jnp.sqrt(jnp.float32(num_pairs * 2))
    b_bound = 1.0 / (C_in ** 0.5)
    bias = jax.random.uniform(kb, (C_out,), jnp.float32, -b_bound, b_bound)
    return weight, bias


if __name__ == "__main__":
    # hidden_states_size=32, number_of_paired_input_weightings=2,
    # batch=2, sequence length=16  ->  x: [2, 32, 16], conv out channels = 128
    HIDDEN = 32
    NUM_PAIRS = 2
    B, L = 2, 16

    key = jax.random.PRNGKey(0)
    kx, kp = jax.random.split(key)
    x = jax.random.normal(kx, (B, HIDDEN, L), jnp.float32)
    weight, bias = init_params(kp, HIDDEN, NUM_PAIRS)

    refs = _reference(x, weight, bias, hidden_size=HIDDEN, num_pairs=NUM_PAIRS)

    # f32 path (default): tight check against the reference.
    outs = compute_summed_outputs_every_pair(
        x, weight, bias, hidden_size=HIDDEN, num_pairs=NUM_PAIRS)
    outs = [jax.block_until_ready(o) for o in outs]
    for o, r in zip(outs, refs):
        assert o.shape == (B, HIDDEN, L)
        assert jnp.allclose(o, r, atol=1e-4, rtol=1e-4), "f32 mismatch vs reference"

    # bf16 MXU path (f32 accumulate): loose check.
    outs_bf16 = compute_summed_outputs_every_pair(
        x, weight, bias, hidden_size=HIDDEN, num_pairs=NUM_PAIRS,
        compute_dtype=jnp.bfloat16)
    outs_bf16 = [jax.block_until_ready(o) for o in outs_bf16]
    for o, r in zip(outs_bf16, refs):
        assert o.shape == (B, HIDDEN, L)
        assert jnp.allclose(o, r, atol=5e-2, rtol=5e-2), "bf16 mismatch vs reference"

    print("KERNEL_OK")
</pallas_src>

<mosaic_0001>
module attributes {stable_mosaic.version = 11 : i64} {
  func.func @_pmswc_kernel(%arg0: i32, %arg1: memref<1x32x16xf32, #tpu.memory_space<vmem>>, %arg2: memref<64x32xf32, #tpu.memory_space<vmem>>, %arg3: memref<64x32xf32, #tpu.memory_space<vmem>>, %arg4: memref<64x1xf32, #tpu.memory_space<vmem>>, %arg5: memref<64x1xf32, #tpu.memory_space<vmem>>, %arg6: memref<16x16xf32, #tpu.memory_space<vmem>>, %arg7: memref<1x64x16xf32, #tpu.memory_space<vmem>>) attributes {dimension_semantics = [#tpu.dimension_semantics<parallel>], iteration_bounds = array<i64: 2>, scalar_prefetch = 0 : i64, scratch_operands = 0 : i64, tpu.core_type = #tpu.core_type<tc>, window_params = [{transform_indices = @transform_0, window_bounds = array<i64: 1, 32, 16>}, {pipeline_mode = #tpu.pipeline_mode<synchronous>, transform_indices = @transform_1, window_bounds = array<i64: 64, 32>}, {pipeline_mode = #tpu.pipeline_mode<synchronous>, transform_indices = @transform_2, window_bounds = array<i64: 64, 32>}, {pipeline_mode = #tpu.pipeline_mode<synchronous>, transform_indices = @transform_3, window_bounds = array<i64: 64, 1>}, {pipeline_mode = #tpu.pipeline_mode<synchronous>, transform_indices = @transform_4, window_bounds = array<i64: 64, 1>}, {pipeline_mode = #tpu.pipeline_mode<synchronous>, transform_indices = @transform_5, window_bounds = array<i64: 16, 16>}, {transform_indices = @transform_6, window_bounds = array<i64: 1, 64, 16>}]} {
    %c0 = arith.constant 0 : index
    %c0_0 = arith.constant 0 : index
    %0 = vector.load %arg2[%c0, %c0_0] : memref<64x32xf32, #tpu.memory_space<vmem>>, vector<64x32xf32>
    %c0_1 = arith.constant 0 : index
    %c0_2 = arith.constant 0 : index
    %1 = vector.load %arg3[%c0_1, %c0_2] : memref<64x32xf32, #tpu.memory_space<vmem>>, vector<64x32xf32>
    %c0_3 = arith.constant 0 : index
    %c0_4 = arith.constant 0 : index
    %2 = vector.load %arg6[%c0_3, %c0_4] : memref<16x16xf32, #tpu.memory_space<vmem>>, vector<16x16xf32>
    %3 = tpu.iota {dimensions = array<i32: 1>} : vector<1x16xi32>
    %c0_5 = arith.constant 0 : index
    %c0_6 = arith.constant 0 : index
    %4 = vector.load %arg4[%c0_5, %c0_6] : memref<64x1xf32, #tpu.memory_space<vmem>>, vector<64x1xf32>
    %c0_i32 = arith.constant 0 : i32
    %5 = vector.broadcast %c0_i32 : i32 to vector<1x16xi32>
    %6 = arith.cmpi sgt, %3, %5 : vector<1x16xi32>
    %c0_7 = arith.constant 0 : index
    %c0_8 = arith.constant 0 : index
    %7 = vector.load %arg5[%c0_7, %c0_8] : memref<64x1xf32, #tpu.memory_space<vmem>>, vector<64x1xf32>
    %cst = arith.constant 0.000000e+00 : f32
    %8 = vector.shape_cast %6 : vector<1x16xi1> to vector<1x16xi1>
    %9 = vector.broadcast %8 : vector<1x16xi1> to vector<64x16xi1>
    %10 = vector.shape_cast %7 : vector<64x1xf32> to vector<64x1xf32>
    %11 = vector.broadcast %10 : vector<64x1xf32> to vector<64x16xf32>
    %12 = vector.broadcast %cst : f32 to vector<64x16xf32>
    %13 = arith.select %9, %11, %12 : vector<64x16xi1>, vector<64x16xf32>
    %14 = vector.broadcast %4 : vector<64x1xf32> to vector<64x16xf32>
    %15 = arith.addf %14, %13 : vector<64x16xf32>
    %c0_9 = arith.constant 0 : index
    %c0_10 = arith.constant 0 : index
    %c0_11 = arith.constant 0 : index
    %16 = vector.load %arg1[%c0_9, %c0_10, %c0_11] : memref<1x32x16xf32, #tpu.memory_space<vmem>>, vector<1x32x16xf32>
    %17 = vector.shape_cast %16 : vector<1x32x16xf32> to vector<32x16xf32>
    %cst_12 = arith.constant dense<0.000000e+00> : vector<32x16xf32>
    %18 = tpu.matmul %17, %2, %cst_12 {dimension_numbers = #tpu.dot_dimension_numbers<[1], [0], [0], [1], [0, 0, 1, 1], [], []>} : vector<32x16xf32>, vector<16x16xf32>, vector<32x16xf32> -> vector<32x16xf32>
    %cst_13 = arith.constant dense<0.000000e+00> : vector<64x16xf32>
    %19 = tpu.matmul %0, %17, %cst_13 {dimension_numbers = #tpu.dot_dimension_numbers<[1], [0], [0], [1], [0, 0, 1, 1], [], []>} : vector<64x32xf32>, vector<32x16xf32>, vector<64x16xf32> -> vector<64x16xf32>
    %cst_14 = arith.constant dense<0.000000e+00> : vector<64x16xf32>
    %20 = tpu.matmul %1, %18, %cst_14 {dimension_numbers = #tpu.dot_dimension_numbers<[1], [0], [0], [1], [0, 0, 1, 1], [], []>} : vector<64x32xf32>, vector<32x16xf32>, vector<64x16xf32> -> vector<64x16xf32>
    %21 = arith.addf %19, %20 : vector<64x16xf32>
    %22 = arith.addf %21, %15 : vector<64x16xf32>
    %c0_15 = arith.constant 0 : index
    %c0_16 = arith.constant 0 : index
    %c0_17 = arith.constant 0 : index
    %23 = vector.load %arg7[%c0_15, %c0_16, %c0_17] : memref<1x64x16xf32, #tpu.memory_space<vmem>>, vector<1x64x16xf32>
    %24 = vector.shape_cast %23 : vector<1x64x16xf32> to vector<64x16xf32>
    %25 = vector.shape_cast %22 : vector<64x16xf32> to vector<1x64x16xf32>
    tpu.vector_store %arg7[%c0_15, %c0_16, %c0_17], %25 {strides = array<i32>} : memref<1x64x16xf32, #tpu.memory_space<vmem>>, vector<1x64x16xf32>,
    return
  }
  func.func @transform_0(%arg0: i32) -> (i32, i32, i32) {
    %c0_i32 = arith.constant 0 : i32
    %c0_i32_0 = arith.constant 0 : i32
    %c0_i32_1 = arith.constant 0 : i32
    return %arg0, %c0_i32, %c0_i32_0 : i32, i32, i32
  }
  func.func @transform_1(%arg0: i32) -> (i32, i32) {
    %c0_i32 = arith.constant 0 : i32
    %c0_i32_0 = arith.constant 0 : i32
    %c0_i32_1 = arith.constant 0 : i32
    return %c0_i32, %c0_i32_0 : i32, i32
  }
  func.func @transform_2(%arg0: i32) -> (i32, i32) {
    %c0_i32 = arith.constant 0 : i32
    %c0_i32_0 = arith.constant 0 : i32
    %c0_i32_1 = arith.constant 0 : i32
    return %c0_i32, %c0_i32_0 : i32, i32
  }
  func.func @transform_3(%arg0: i32) -> (i32, i32) {
    %c0_i32 = arith.constant 0 : i32
    %c0_i32_0 = arith.constant 0 : i32
    %c0_i32_1 = arith.constant 0 : i32
    return %c0_i32, %c0_i32_0 : i32, i32
  }
  func.func @transform_4(%arg0: i32) -> (i32, i32) {
    %c0_i32 = arith.constant 0 : i32
    %c0_i32_0 = arith.constant 0 : i32
    %c0_i32_1 = arith.constant 0 : i32
    return %c0_i32, %c0_i32_0 : i32, i32
  }
  func.func @transform_5(%arg0: i32) -> (i32, i32) {
    %c0_i32 = arith.constant 0 : i32
    %c0_i32_0 = arith.constant 0 : i32
    %c0_i32_1 = arith.constant 0 : i32
    return %c0_i32, %c0_i32_0 : i32, i32
  }
  func.func @transform_6(%arg0: i32) -> (i32, i32, i32) {
    %c0_i32 = arith.constant 0 : i32
    %c0_i32_0 = arith.constant 0 : i32
    %c0_i32_1 = arith.constant 0 : i32
    return %arg0, %c0_i32, %c0_i32_0 : i32, i32, i32
  }
}

</mosaic_0001>

<bundles_post_ra>
// kernel: tpu_custom_call.1
= control target key start
LH: loop header
LB: loop body
LE: loop exit
PB: predicated region body
PF: predicated region fallthrough
CT: control target
= control target key end

     0   :  { %s987_s21 = smov 0   ;;  %s1156_s0 = inlined_call_operand.vmem [shape: f32[2,32,16], index: 0, kind: input, shape index: {}]   ;;  %s1157_s1 = inlined_call_operand.vmem [shape: f32[64,32], index: 1, kind: input, shape index: {}]   ;;  %s1158_s2 = inlined_call_operand.vmem [shape: f32[64,32], index: 2, kind: input, shape index: {}]   ;;  %s1159_s3 = inlined_call_operand.vmem [shape: f32[64,1], index: 3, kind: input, shape index: {}]   ;;  %s1160_s4 = inlined_call_operand.vmem [shape: f32[64,1], index: 4, kind: input, shape index: {}]   ;;  %s1161_s5 = inlined_call_operand.vmem [shape: f32[16,16], index: 5, kind: input, shape index: {}]   ;;  %s1162_s6 = inlined_call_operand.vmem [shape: f32[2,64,16], index: 6, kind: output, shape index: {}]  }
   0x1 LB: > { %s819_s22 = sadd.s32 4294967295, %s949_s21   ;;  %p823_p0 = scmp.ge.s32.totalorder %s949_s21, 1  ;;  %s949_s21 = sphi %s987_s21, %s16_s21  }
   0x2   : > { %p212_p1 = scmp.lt.s32.totalorder %s949_s21, 3 }
   0x4   : > { %p213_p2 = pnand %p823_p0, %p212_p1 }
   0x5   : > { %p242_p3 = scmp.lt.s32.totalorder (!%p213_p2), %s819_s22, 1 }
   0x6   : > { %216 = sbr.rel (%p213_p2) target bundleno = 433 (0x1b1), region = 44 }
   0xb   : > { %v269_v0 = vld [vmem:[%s1161_s5 + $0x8] sm:$0xff]  ;;  %v268_v1 = vld [vmem:[%s1161_s5] sm:$0xff]  ;;  %s1164_s22 = smov (!%p242_p3, %s819_s22), 1  ;;  %vm391_vm0 = vcmask 130048   ;;  %vm489_vm1 = vcmask 261120   ;;  %v254_v9 = vld [vmem:[%s1157_s1 + $0x10] sm:$0xff]  ;;  %v270_v51 = vlaneseq }
   0xc   : > { %882 = vmatprep.subr.mxu0 %v269_v0  ;;  %s850_s27 = sshll.u32 %s1164_s22, 5  ;;  %v252_v6 = vld [vmem:[%s1157_s1] sm:$0xff]  ;;  %v253_v7 = vld [vmem:[%s1157_s1 + $0x8] sm:$0xff]  ;;  %v255_v10 = vld [vmem:[%s1157_s1 + $0x18] sm:$0xff]  ;;  %v951_v17 = vmov 0   ;;  %s851_s29 = sshll.u32 %s1164_s22, 6 }
   0xd   : > { %883 = vmatpush3.msra.mxu0 %v269_v0  ;;  %s246_s30 = scalar_lea.vmem %s1156_s0, %s850_s27  ;;  %v260_v8 = vld [vmem:[%s1158_s2] sm:$0xff]  ;;  %v257_v12 = vld [vmem:[%s1157_s1 + $0x28] sm:$0xff]  ;;  %v258_v13 = vld [vmem:[%s1157_s1 + $0x30] sm:$0xff]  ;;  %942 = vset.pattern.permute.xlu1 %v951_v17  ;;  %v271_v54 = vand.u32 127, %v270_v51  ;;  %s1129_s8 = scalar_lea.vmem %s1162_s6, %s851_s29 }
   0xe   : > { %884 = vmatprep.subr.mxu0 %v268_v1  ;;  %v387_v2 = vld [vmem:[%s246_s30] sm:$0xff]  ;;  %v388_v3 = vld [vmem:[%s246_s30 + $0x8] sm:$0xff]  ;;  %v389_v4 = vld [vmem:[%s246_s30 + $0x10] sm:$0xff]  ;;  %900 = vmatprep.mubr.msk.f32.mxu1 %vm489_vm1, %v260_v8 }
   0xf   : > { %885 = vmatpush3.msra.mxu0 %v268_v1  ;;  %886 = vmatprep.mubr.msk.f32.mxu0 %vm391_vm0, %v387_v2  ;;  %v390_v5 = vld [vmem:[%s246_s30 + $0x18] sm:$0xff]  ;;  %v256_v11 = vld [vmem:[%s1157_s1 + $0x20] sm:$0xff]  ;;  %v283_v15 = vld [vmem:[%s1160_s4 + $0x10] sm:$0xff]  ;;  %vm280_vm2 = vcmp.gt.s32.totalorder %v271_v54, 0 }
  0x10   : > { %887 = vmatmul.mubr.msk.f32.vlgmr.msra.gmra.mxu0 %vm391_vm0, %v388_v3  ;;  %912 = vmatprep.subr.mxu0 %v390_v5  ;;  %v259_v14 = vld [vmem:[%s1157_s1 + $0x38] sm:$0xff]  ;;  %v281_v16 = vld [vmem:[%s1160_s4] sm:$0xff]  ;;  %v282_v19 = vld [vmem:[%s1160_s4 + $0x8] sm:$0xff] }
  0x11   : > { %889 = vmatprep.mubr.msk.f32.mxu0 %vm391_vm0, %v389_v4  ;;  %913 = vmatpush3.msra.mxu0 %v390_v5  ;;  %v284_v18 = vld [vmem:[%s1160_s4 + $0x18] sm:$0xff]  ;;  %v286_v20 = vld [vmem:[%s1160_s4 + $0x28] sm:$0xff]  ;;  %v285_v21 = vld [vmem:[%s1160_s4 + $0x20] sm:$0xff] }
  0x12   : > { %914 = vmatprep.subr.mxu0 %v389_v4  ;;  %941 = vset.pattern.permute.xlu0 %v951_v17  ;;  %v288_v22 = vld [vmem:[%s1160_s4 + $0x38] sm:$0xff]  ;;  %v287_v23 = vld [vmem:[%s1160_s4 + $0x30] sm:$0xff]  ;;  %v273_v24 = vld [vmem:[%s1159_s3 + $0x8] sm:$0xff] }
  0x13   : > { %915 = vmatpush3.msra.mxu0 %v389_v4  ;;  %303 = vperm.xlu1 %942, %v283_v15   ;;  %v272_v25 = vld [vmem:[%s1159_s3] sm:$0xff]  ;;  %v275_v26 = vld [vmem:[%s1159_s3 + $0x18] sm:$0xff]  ;;  %v274_v27 = vld [vmem:[%s1159_s3 + $0x10] sm:$0xff] }
  0x14   : > { %890 = vmatmul.mubr.msk.f32.gmra.mxu0 %vm391_vm0, %v390_v5  ;;  %916 = vmatprep.subr.mxu0 %v388_v3  ;;  %v277_v28 = vld [vmem:[%s1159_s3 + $0x28] sm:$0xff]  ;;  %v276_v29 = vld [vmem:[%s1159_s3 + $0x20] sm:$0xff]  ;;  %v279_v30 = vld [vmem:[%s1159_s3 + $0x38] sm:$0xff] }
  0x15   : > { %917 = vmatpush3.msra.mxu0 %v388_v3  ;;  %920 = vmatprep.mubr.msk.f32.mxu0 %vm489_vm1, %v252_v6  ;;  %v278_v31 = vld [vmem:[%s1159_s3 + $0x30] sm:$0xff]  ;;  %v261_v36 = vld [vmem:[%s1158_s2 + $0x8] sm:$0xff]  ;;  %v263_v38 = vld [vmem:[%s1158_s2 + $0x18] sm:$0xff] }
  0x16   : > { %918 = vmatprep.subr.mxu0 %v387_v2  ;;  %293 = vperm.xlu0 %941, %v281_v16   ;;  %v262_v37 = vld [vmem:[%s1158_s2 + $0x10] sm:$0xff]  ;;  %v264_v39 = vld [vmem:[%s1158_s2 + $0x20] sm:$0xff]  ;;  %v265_v40 = vld [vmem:[%s1158_s2 + $0x28] sm:$0xff] }
  0x17   : > { %919 = vmatpush3.msra.mxu0 %v387_v2  ;;  %308 = vperm.xlu1 %942, %v284_v18   ;;  %v266_v41 = vld [vmem:[%s1158_s2 + $0x30] sm:$0xff]  ;;  %v267_v42 = vld [vmem:[%s1158_s2 + $0x38] sm:$0xff] }
  0x18   : > { %921 = vmatmul.mubr.msk.f32.vlgmr.msra.gmra.mxu0 %vm489_vm1, %v253_v7 }
  0x19   : > { %923 = vmatprep.mubr.msk.f32.mxu0 %vm489_vm1, %v254_v9 }
  0x1a   : > { %298 = vperm.xlu0 %941, %v282_v19  }
  0x1b   : > { %318 = vperm.xlu1 %942, %v286_v20  }
  0x1c   : > { %924 = vmatmul.mubr.msk.f32.gmra.mxu0 %vm489_vm1, %v255_v10 }
  0x1d   : > { %926 = vmatprep.mubr.msk.f32.mxu0 %vm489_vm1, %v256_v11 }
  0x1e   : > { %313 = vperm.xlu0 %941, %v285_v21  }
  0x1f   : > { %328 = vperm.xlu1 %942, %v288_v22  }
  0x20   : > { %927 = vmatmul.mubr.msk.f32.gmra.mxu0 %vm489_vm1, %v257_v12 }
  0x21   : > { %929 = vmatprep.mubr.msk.f32.mxu0 %vm489_vm1, %v258_v13 }
  0x22   : > { %323 = vperm.xlu0 %941, %v287_v23  }
  0x23   : > { %346 = vperm.xlu1 %942, %v273_v24  }
  0x24   : > { %930 = vmatmul.mubr.msk.f32.gmra.mxu0 %vm489_vm1, %v259_v14 }
  0x26   : > { %341 = vperm.xlu0 %941, %v272_v25  }
  0x27   : > { %356 = vperm.xlu1 %942, %v275_v26  }
  0x2a   : > { %351 = vperm.xlu0 %941, %v274_v27  }
  0x2b   : > { %366 = vperm.xlu1 %942, %v277_v28  }
  0x2e   : > { %361 = vperm.xlu0 %941, %v276_v29  }
  0x2f   : > { %376 = vperm.xlu1 %942, %v279_v30  }
  0x32   : > { %371 = vperm.xlu0 %941, %v278_v31  }
  0x8e   : > { %v304_v43 = vpop.permute.xlu1 %303 }
  0x8f   : > { %v333_v9 = vsel %vm280_vm2, %v304_v43, 0.0 }
  0x91   : > { %v294_v44 = vpop.permute.xlu0 %293 }
  0x92   : > { %v309_v45 = vpop.permute.xlu1 %308  ;;  %v331_v62 = vsel %vm280_vm2, %v294_v44, 0.0 }
  0x93   : > { %v334_v2 = vsel %vm280_vm2, %v309_v45, 0.0 }
  0x95   : > { %v299_v46 = vpop.permute.xlu0 %298 }
  0x96   : > { %v319_v47 = vpop.permute.xlu1 %318  ;;  %v332_v59 = vsel %vm280_vm2, %v299_v46, 0.0 }
  0x97   : > { %v336_v15 = vsel %vm280_vm2, %v319_v47, 0.0 }
  0x99   : > { %v314_v48 = vpop.permute.xlu0 %313 }
  0x9a   : > { %v329_v49 = vpop.permute.xlu1 %328  ;;  %v335_v21 = vsel %vm280_vm2, %v314_v48, 0.0 }
  0x9b   : > { %v338_v27 = vsel %vm280_vm2, %v329_v49, 0.0 }
  0x9d   : > { %v324_v52 = vpop.permute.xlu0 %323 }
  0x9e   : > { %v347_v55 = vpop.permute.xlu1 %346 }
  0x9f   : > { %v380_v0 = vadd.f32 %v347_v55, %v332_v59 }
  0xa1   : > { %v342_v56 = vpop.permute.xlu0 %341 }
  0xa2   : > { %v357_v58 = vpop.permute.xlu1 %356  ;;  %v379_v5 = vadd.f32 %v342_v56, %v331_v62 }
  0xa3   : > { %v382_v11 = vadd.f32 %v357_v58, %v334_v2 }
  0xa5   : > { %v352_v61 = vpop.permute.xlu0 %351 }
  0xa6   : > { %v367_v6 = vpop.permute.xlu1 %366  ;;  %v381_v18 = vadd.f32 %v352_v61, %v333_v9 }
  0xa7   : > { %v384_v23 = vadd.f32 %v367_v6, %v336_v15 }
  0xa9   : > { %v362_v12 = vpop.permute.xlu0 %361 }
  0xaa   : > { %v377_v24 = vpop.permute.xlu1 %376  ;;  %v383_v30 = vadd.f32 %v362_v12, %v335_v21 }
  0xd0   : > { %v888_v32 = vpop.f32.mrf.mxu0 }
  0xd2   : > { %v470_v33 = vpop.f32.mrf.mxu0 }
  0xd4   : > { %v891_v34 = vpop.f32.mrf.mxu0 }
  0xd5   : > { %892 = vmatprep.subr.mxu1 %v891_v34 }
  0xd6   : > { %v480_v35 = vpop.f32.mrf.mxu0  ;;  %893 = vmatpush3.msra.mxu1 %v891_v34  ;;  %v372_v34 = vpop.permute.xlu0 %371 }
  0xd7   : > { %894 = vmatprep.subr.mxu1 %v480_v35 }
  0xd8   : > { %895 = vmatpush3.msra.mxu1 %v480_v35  ;;  %v922_v50 = vpop.f32.mrf.mxu0 }
  0xd9   : > { %896 = vmatprep.subr.mxu1 %v888_v32 }
  0xda   : > { %897 = vmatpush3.msra.mxu1 %v888_v32  ;;  %v709_v53 = vpop.f32.mrf.mxu0 }
  0xdb   : > { %898 = vmatprep.subr.mxu1 %v470_v33 }
  0xdc   : > { %899 = vmatpush3.msra.mxu1 %v470_v33  ;;  %v925_v57 = vpop.f32.mrf.mxu0  ;;  %v337_v33 = vsel %vm280_vm2, %v324_v52, 0.0 }
  0xdd   : > { %901 = vmatmul.mubr.msk.f32.vlgmr.msra.gmra.mxu1 %vm489_vm1, %v261_v36  ;;  %v386_v36 = vadd.f32 %v377_v24, %v338_v27 }
  0xde   : > { %903 = vmatprep.mubr.msk.f32.mxu1 %vm489_vm1, %v262_v37  ;;  %v719_v60 = vpop.f32.mrf.mxu0 }
  0xe0   : > { %v928_v4 = vpop.f32.mrf.mxu0 }
  0xe1   : > { %904 = vmatmul.mubr.msk.f32.gmra.mxu1 %vm489_vm1, %v263_v38 }
  0xe2   : > { %906 = vmatprep.mubr.msk.f32.mxu1 %vm489_vm1, %v264_v39  ;;  %v729_v17 = vpop.f32.mrf.mxu0 }
  0xe4   : > { %v931_v29 = vpop.f32.mrf.mxu0 }
  0xe5   : > { %907 = vmatmul.mubr.msk.f32.gmra.mxu1 %vm489_vm1, %v265_v40 }
  0xe6   : > { %909 = vmatprep.mubr.msk.f32.mxu1 %vm489_vm1, %v266_v41  ;;  %v739_v39 = vpop.f32.mrf.mxu0  ;;  %v385_v41 = vadd.f32 %v372_v34, %v337_v33 }
  0xe9   : > { %910 = vmatmul.mubr.msk.f32.gmra.mxu1 %vm489_vm1, %v267_v42 }
 0x19d   : > { %v902_v63 = vpop.f32.mrf.mxu1 }
 0x19e   : > { %v715_v1 = vadd.f32 %v922_v50, %v902_v63 }
 0x19f   : > { %v580_v3 = vpop.f32.mrf.mxu1 }
 0x1a0   : > { %v749_v7 = vadd.f32 %v715_v1, %v380_v0  ;;  %v710_v8 = vadd.f32 %v709_v53, %v580_v3 }
 0x1a1   : > { %v905_v10 = vpop.f32.mrf.mxu1 }
 0x1a2   : > { %757 = vst.msk [vmem:[%s1129_s8 + $0x8] sm:$0xff] %vm391_vm0, %v749_v7  ;;  %v748_v13 = vadd.f32 %v710_v8, %v379_v5  ;;  %v725_v14 = vadd.f32 %v925_v57, %v905_v10 }
 0x1a3   : > { %v590_v16 = vpop.f32.mrf.mxu1 }
 0x1a4   : > { %756 = vst.msk [vmem:[%s1129_s8] sm:$0xff] %vm391_vm0, %v748_v13  ;;  %v751_v19 = vadd.f32 %v725_v14, %v382_v11  ;;  %v720_v20 = vadd.f32 %v719_v60, %v590_v16 }
 0x1a5   : > { %v908_v22 = vpop.f32.mrf.mxu1 }
 0x1a6   : > { %759 = vst.msk [vmem:[%s1129_s8 + $0x18] sm:$0xff] %vm391_vm0, %v751_v19  ;;  %v750_v25 = vadd.f32 %v720_v20, %v381_v18  ;;  %v735_v26 = vadd.f32 %v928_v4, %v908_v22 }
 0x1a7   : > { %v600_v28 = vpop.f32.mrf.mxu1 }
 0x1a8   : > { %758 = vst.msk [vmem:[%s1129_s8 + $0x10] sm:$0xff] %vm391_vm0, %v750_v25  ;;  %v753_v31 = vadd.f32 %v735_v26, %v384_v23  ;;  %v730_v32 = vadd.f32 %v729_v17, %v600_v28 }
 0x1a9   : > { %v911_v35 = vpop.f32.mrf.mxu1 }
 0x1aa   : > { %761 = vst.msk [vmem:[%s1129_s8 + $0x28] sm:$0xff] %vm391_vm0, %v753_v31  ;;  %v752_v37 = vadd.f32 %v730_v32, %v383_v30  ;;  %v745_v38 = vadd.f32 %v931_v29, %v911_v35 }
 0x1ab   : > { %v610_v40 = vpop.f32.mrf.mxu1 }
 0x1ac   : > { %760 = vst.msk [vmem:[%s1129_s8 + $0x20] sm:$0xff] %vm391_vm0, %v752_v37  ;;  %v755_v42 = vadd.f32 %v745_v38, %v386_v36  ;;  %v740_v43 = vadd.f32 %v739_v39, %v610_v40 }
 0x1ae   : > { %763 = vst.msk [vmem:[%s1129_s8 + $0x38] sm:$0xff] %vm391_vm0, %v755_v42  ;;  %v754_v44 = vadd.f32 %v740_v43, %v385_v41 }
 0x1b0   : > { %762 = vst.msk [vmem:[%s1129_s8 + $0x30] sm:$0xff] %vm391_vm0, %v754_v44 }
 0x1b1 PF: > { %s16_s21 = sadd.s32 1, %s949_s21  }
 0x1b2   : > { %p13_p4 = scmp.ge.s32.totalorder %s16_s21, 4  }
 0x1b4   :  { %15 = sbr.rel (!%p13_p4) target bundleno = 1 (0x1), region = 74 }

</bundles_post_ra>
